<compile_context>
chip_gen: v7x
topology: tpu7x:2x2x1
jax: 0.10.0
libtpu: 0.0.40
codegen_flags: <defaults>
</compile_context>

<pallas_src>
import functools

import jax
import jax.numpy as jnp
from jax import lax
from jax.experimental import pallas as pl
from jax.experimental.pallas import tpu as pltpu


def rs_gcn_kernel(v_ref, wcat_ref, bcat_ref, ww_ref, bw_ref, out_ref, *,
                  inter_channels, batch_tile, n_pad, n_valid, compute_dtype):
    """One grid step processes a (D, batch_tile*n_pad) lane-dense slab of v."""
    C = inter_channels
    lanes = batch_tile * n_pad
    inv_n = jnp.float32(1.0 / n_valid)

    w_cat = wcat_ref[...]            # (3C, D)  compute dtype
    b_cat = bcat_ref[...]            # (3C, 1)  f32
    w_w = ww_ref[...]                # (D, C)   compute dtype (eval-mode BN folded in)
    b_w = bw_ref[...]                # (D, 1)   f32           (eval-mode BN folded in)

    vc = v_ref[...].astype(compute_dtype)                                   # (D, lanes)

    # Fused g / theta / phi 1x1 convs in ONE lane-dense MXU pass over the whole tile,
    # f32 accumulate; bias broadcast happens once per grid step (hoisted).
    proj = jnp.dot(w_cat, vc, preferred_element_type=jnp.float32) + b_cat   # (3C, lanes)

    if n_pad != n_valid:
        # Zero projections at padded sequence positions so the attention sums are exact.
        col = lax.broadcasted_iota(jnp.int32, (1, lanes), 1) % n_pad
        proj = jnp.where(col < n_valid, proj, 0.0)

    # NOTE: slices below stay within (8,128) tiles as long as C is a multiple of 8.
    g = proj[0 * C:1 * C]            # (C, lanes)
    th = proj[1 * C:2 * C]           # (C, lanes)
    ph = proj[2 * C:3 * C]           # (C, lanes)

    # Per-sample reassociated attention (exact, no nonlinearity on R):
    #   y^T = (g @ phi^T / N) @ theta  -- (C,C) intermediate, never the (N,N) R.
    # Lane slices are at multiples of n_pad (itself a multiple of 128) -> aligned.
    y_parts = []
    for b in range(batch_tile):      # small static unroll; each iteration is independent
        sl = slice(b * n_pad, (b + 1) * n_pad)
        g_b = g[:, sl].astype(compute_dtype)
        ph_b = ph[:, sl].astype(compute_dtype)
        th_b = th[:, sl].astype(compute_dtype)
        m_b = lax.dot_general(g_b, ph_b, (((1,), (1,)), ((), ())),
                              preferred_element_type=jnp.float32) * inv_n   # (C, C)
        y_parts.append(jnp.dot(m_b.astype(compute_dtype), th_b,
                               preferred_element_type=jnp.float32))         # (C, n_pad)
    y = y_parts[0] if batch_tile == 1 else jnp.concatenate(y_parts, axis=1)  # (C, lanes)

    # W conv back to D channels (BN folded), residual add; lane-dense output store.
    wy = jnp.dot(w_w, y.astype(compute_dtype),
                 preferred_element_type=jnp.float32) + b_w                  # (D, lanes)
    out_ref[...] = (wy + v_ref[...].astype(jnp.float32)).astype(out_ref.dtype)


def _block_vmem_bytes(bt, D, n_pad, C, in_bytes, compute_bytes):
    """Rough per-grid-step VMEM footprint (streaming blocks + intermediates)."""
    lanes = bt * n_pad
    stream = 2 * 2 * D * lanes * in_bytes            # in + out blocks, double-buffered
    tmp = lanes * ((3 * C + C + D) * 4 + (D + 3 * C + C) * compute_bytes)
    return stream + tmp


def _pick_batch_tile(B, D, n_pad, C, in_bytes, compute_bytes, vmem_budget=20 << 20):
    """Largest divisor of B that fits the VMEM budget while keeping a pipelined grid."""
    fitting = [d for d in range(1, B + 1)
               if B % d == 0 and _block_vmem_bytes(d, D, n_pad, C, in_bytes,
                                                   compute_bytes) <= vmem_budget]
    if not fitting:
        fitting = [1]
    # Prefer enough grid steps to hide DMA (and feed both v7x TensorCores), then the
    # widest lane dim (best MXU fill, fewest per-step overheads).
    for min_steps in (8, 4, 2, 1):
        good = [d for d in fitting if B // d >= min_steps]
        if good:
            return max(good)
    return max(fitting)


def rs_gcn_forward(v, params, eps=1e-5, compute_dtype=jnp.bfloat16, batch_tile=None):
    """v: (B, D, N) float32, mirrors Rs_GCN.forward (eval-mode BatchNorm)."""
    B, D, N = v.shape
    C = params["w_g"].shape[0]       # inter_channels
    n_pad = ((N + 127) // 128) * 128  # lane alignment (realistic Rs_GCN uses N=36)

    # Fold eval-mode BatchNorm1d (running stats + affine) into the W conv.
    # TODO(synk): training-mode BatchNorm (batch statistics) is not implemented.
    gamma_eff = params["bn_gamma"] / jnp.sqrt(params["bn_var"] + eps)
    beta_eff = params["bn_beta"] - params["bn_mean"] * gamma_eff
    w_w_eff = gamma_eff[:, None] * params["w_w"]                       # (D, C)
    b_w_eff = (gamma_eff * params["b_w"] + beta_eff)[:, None]          # (D, 1)

    # Fuse the three projection weights into one matmul.
    w_cat = jnp.concatenate(
        [params["w_g"], params["w_theta"], params["w_phi"]], axis=0)   # (3C, D)
    b_cat = jnp.concatenate(
        [params["b_g"], params["b_theta"], params["b_phi"]])[:, None]  # (3C, 1)

    in_bytes = jnp.dtype(v.dtype).itemsize
    c_bytes = jnp.dtype(compute_dtype).itemsize
    if batch_tile is None:
        batch_tile = _pick_batch_tile(B, D, n_pad, C, in_bytes, c_bytes)
    assert B % batch_tile == 0, "batch_tile must divide the batch size"

    # Layout plumbing (done by XLA, outside the kernel): (B, D, N) -> (D, B*n_pad) so the
    # kernel's matmuls and output stores are lane-dense over batch*sequence.
    v2 = jnp.transpose(v, (1, 0, 2))
    if n_pad != N:
        v2 = jnp.pad(v2, ((0, 0), (0, 0), (0, n_pad - N)))
    v2 = v2.reshape(D, B * n_pad)

    lanes = batch_tile * n_pad
    grid = (B // batch_tile,)

    # Explicit VMEM budgeting (weights are single-buffered; streaming blocks double).
    weight_bytes = (3 * C * D + D * C) * c_bytes + (3 * C + D) * 4
    vmem_est = weight_bytes + _block_vmem_bytes(batch_tile, D, n_pad, C, in_bytes, c_bytes)
    vmem_limit = int(min(max(vmem_est * 3 // 2 + (2 << 20), 16 << 20), 40 << 20))

    flops = int(B) * int(n_pad) * (8 * C * D + 4 * C * C)
    bytes_accessed = 2 * B * D * n_pad * in_bytes + weight_bytes
    cost = pl.CostEstimate(flops=flops, transcendentals=0,
                           bytes_accessed=int(bytes_accessed))

    kernel = functools.partial(
        rs_gcn_kernel, inter_channels=C, batch_tile=batch_tile,
        n_pad=n_pad, n_valid=N, compute_dtype=compute_dtype)

    # Grid-invariant weights/biases: constant index_map + single buffer (no duplicate
    # VMEM copy -- critical at real D=C sizes on v7x's 64 MiB VMEM).
    const_spec = lambda shape: pl.BlockSpec(shape, lambda i: (0, 0),
                                            pipeline_mode=pl.Buffered(1))

    out2 = pl.pallas_call(
        kernel,
        out_shape=jax.ShapeDtypeStruct((D, B * n_pad), v.dtype),
        grid=grid,
        in_specs=[
            pl.BlockSpec((D, lanes), lambda i: (0, i)),                # v slab (streamed)
            const_spec((3 * C, D)),                                    # fused proj W
            const_spec((3 * C, 1)),                                    # fused proj bias
            const_spec((D, C)),                                        # W conv (BN folded)
            const_spec((D, 1)),                                        # W conv bias
        ],
        out_specs=pl.BlockSpec((D, lanes), lambda i: (0, i)),
        compiler_params=pltpu.CompilerParams(
            dimension_semantics=("parallel",),
            vmem_limit_bytes=vmem_limit),
        cost_estimate=cost,
    )(
        v2,
        w_cat.astype(compute_dtype),
        b_cat.astype(jnp.float32),
        w_w_eff.astype(compute_dtype),
        b_w_eff.astype(jnp.float32),
    )

    out = out2.reshape(D, B, n_pad)[:, :, :N]
    return jnp.transpose(out, (1, 0, 2))


def init_params(key, in_channels, inter_channels, randomize_bn=False):
    """Synthetic init matching Rs_GCN.__init__ shapes (bn_layer=True).

    randomize_bn=True replaces the PyTorch constant-zero BN init with random stats so
    the attention path actually contributes to the output (needed for a meaningful test).
    """
    ks = jax.random.split(key, 12)
    bound_in = 1.0 / jnp.sqrt(in_channels)
    bound_c = 1.0 / jnp.sqrt(inter_channels)
    u = lambda k, shape, b: jax.random.uniform(k, shape, jnp.float32, -b, b)
    params = {
        # Conv1d(in, inter, k=1) weights squeezed to 2-D (out, in)
        "w_g": u(ks[0], (inter_channels, in_channels), bound_in),
        "b_g": u(ks[1], (inter_channels,), bound_in),
        "w_theta": u(ks[2], (inter_channels, in_channels), bound_in),
        "b_theta": u(ks[3], (inter_channels,), bound_in),
        "w_phi": u(ks[4], (inter_channels, in_channels), bound_in),
        "b_phi": u(ks[5], (inter_channels,), bound_in),
        # W = Conv1d(inter, in, k=1) + BatchNorm1d(in)
        "w_w": u(ks[6], (in_channels, inter_channels), bound_c),
        "b_w": u(ks[7], (in_channels,), bound_c),
    }
    if randomize_bn:
        params.update({
            "bn_gamma": jax.random.uniform(ks[8], (in_channels,), jnp.float32, 0.5, 1.5),
            "bn_beta": 0.1 * jax.random.normal(ks[9], (in_channels,), jnp.float32),
            "bn_mean": 0.1 * jax.random.normal(ks[10], (in_channels,), jnp.float32),
            "bn_var": jax.random.uniform(ks[11], (in_channels,), jnp.float32, 0.5, 1.5),
        })
    else:
        params.update({
            "bn_gamma": jnp.zeros((in_channels,), jnp.float32),  # nn.init.constant_(W[1].weight, 0)
            "bn_beta": jnp.zeros((in_channels,), jnp.float32),   # nn.init.constant_(W[1].bias, 0)
            "bn_mean": jnp.zeros((in_channels,), jnp.float32),
            "bn_var": jnp.ones((in_channels,), jnp.float32),
        })
    return params


def rs_gcn_reference(v, params, eps=1e-5):
    """Pure-JAX reference mirroring the PyTorch forward (materializes R; for verification)."""
    conv1 = lambda x, w, b: jnp.einsum("oi,bin->bon", w, x) + b[None, :, None]
    g_v = jnp.transpose(conv1(v, params["w_g"], params["b_g"]), (0, 2, 1))
    theta_v = jnp.transpose(conv1(v, params["w_theta"], params["b_theta"]), (0, 2, 1))
    phi_v = conv1(v, params["w_phi"], params["b_phi"])
    R = jnp.einsum("bnc,bcm->bnm", theta_v, phi_v)
    R = R / R.shape[-1]
    y = jnp.einsum("bnm,bmc->bnc", R, g_v)
    y = jnp.transpose(y, (0, 2, 1))
    wy = conv1(y, params["w_w"], params["b_w"])
    gamma_eff = params["bn_gamma"] / jnp.sqrt(params["bn_var"] + eps)
    beta_eff = params["bn_beta"] - params["bn_mean"] * gamma_eff
    wy = wy * gamma_eff[None, :, None] + beta_eff[None, :, None]
    return wy + v


if __name__ == "__main__":
    import numpy as np

    key = jax.random.PRNGKey(0)
    k_v, k_p, k_v2, k_p2 = jax.random.split(key, 4)

    # Case 1: lane-aligned sequence length.
    B, D, C, N = 2, 32, 16, 128   # batch, in_channels, inter_channels, sequence length
    v = jax.random.normal(k_v, (B, D, N), jnp.float32)
    # Randomized BN stats so the non-residual (attention) branch is actually exercised.
    params = init_params(k_p, D, C, randomize_bn=True)
    ref = jax.block_until_ready(rs_gcn_reference(v, params))

    # f32 MXU path: tight check of the reassociated attention math.
    out_f32 = jax.block_until_ready(
        rs_gcn_forward(v, params, compute_dtype=jnp.float32))
    assert out_f32.shape == (B, D, N)
    np.testing.assert_allclose(np.asarray(out_f32), np.asarray(ref),
                               rtol=1e-4, atol=1e-4)

    # bf16-operand / f32-accumulate path (default): loose tolerance sanity check.
    out_bf16 = jax.block_until_ready(
        rs_gcn_forward(v, params, compute_dtype=jnp.bfloat16))
    assert out_bf16.shape == (B, D, N)
    np.testing.assert_allclose(np.asarray(out_bf16), np.asarray(ref),
                               rtol=2e-2, atol=2e-2)

    # Case 2: unaligned N (realistic Rs_GCN uses N=36 region features) -> padded + masked.
    B2, N2 = 4, 36
    v_b = jax.random.normal(k_v2, (B2, D, N2), jnp.float32)
    params_b = init_params(k_p2, D, C, randomize_bn=True)
    ref_b = jax.block_until_ready(rs_gcn_reference(v_b, params_b))
    out_b = jax.block_until_ready(
        rs_gcn_forward(v_b, params_b, compute_dtype=jnp.float32))
    assert out_b.shape == (B2, D, N2)
    np.testing.assert_allclose(np.asarray(out_b), np.asarray(ref_b),
                               rtol=1e-4, atol=1e-4)

    print("KERNEL_OK")
</pallas_src>

<mosaic_0001>
module attributes {stable_mosaic.version = 11 : i64} {
  func.func @rs_gcn_kernel(%arg0: i32, %arg1: memref<32x128xf32, #tpu.memory_space<vmem>>, %arg2: memref<48x32xf32, #tpu.memory_space<vmem>>, %arg3: memref<48x1xf32, #tpu.memory_space<vmem>>, %arg4: memref<32x16xf32, #tpu.memory_space<vmem>>, %arg5: memref<32x1xf32, #tpu.memory_space<vmem>>, %arg6: memref<32x128xf32, #tpu.memory_space<vmem>>) attributes {dimension_semantics = [#tpu.dimension_semantics<parallel>], iteration_bounds = array<i64: 2>, scalar_prefetch = 0 : i64, scratch_operands = 0 : i64, tpu.core_type = #tpu.core_type<tc>, window_params = [{transform_indices = @transform_0, window_bounds = array<i64: 32, 128>}, {pipeline_mode = #tpu.pipeline_mode<synchronous>, transform_indices = @transform_1, window_bounds = array<i64: 48, 32>}, {pipeline_mode = #tpu.pipeline_mode<synchronous>, transform_indices = @transform_2, window_bounds = array<i64: 48, 1>}, {pipeline_mode = #tpu.pipeline_mode<synchronous>, transform_indices = @transform_3, window_bounds = array<i64: 32, 16>}, {pipeline_mode = #tpu.pipeline_mode<synchronous>, transform_indices = @transform_4, window_bounds = array<i64: 32, 1>}, {transform_indices = @transform_5, window_bounds = array<i64: 32, 128>}]} {
    %c0 = arith.constant 0 : index
    %c0_0 = arith.constant 0 : index
    %0 = vector.load %arg2[%c0, %c0_0] : memref<48x32xf32, #tpu.memory_space<vmem>>, vector<48x32xf32>
    %c0_1 = arith.constant 0 : index
    %c0_2 = arith.constant 0 : index
    %1 = vector.load %arg3[%c0_1, %c0_2] : memref<48x1xf32, #tpu.memory_space<vmem>>, vector<48x1xf32>
    %c0_3 = arith.constant 0 : index
    %c0_4 = arith.constant 0 : index
    %2 = vector.load %arg4[%c0_3, %c0_4] : memref<32x16xf32, #tpu.memory_space<vmem>>, vector<32x16xf32>
    %c0_5 = arith.constant 0 : index
    %c0_6 = arith.constant 0 : index
    %3 = vector.load %arg5[%c0_5, %c0_6] : memref<32x1xf32, #tpu.memory_space<vmem>>, vector<32x1xf32>
    %c0_7 = arith.constant 0 : index
    %c0_8 = arith.constant 0 : index
    %4 = vector.load %arg1[%c0_7, %c0_8] : memref<32x128xf32, #tpu.memory_space<vmem>>, vector<32x128xf32>
    %cst = arith.constant dense<0.000000e+00> : vector<48x128xf32>
    %5 = tpu.matmul %0, %4, %cst {dimension_numbers = #tpu.dot_dimension_numbers<[1], [0], [0], [1], [0, 0, 1, 1], [], []>} : vector<48x32xf32>, vector<32x128xf32>, vector<48x128xf32> -> vector<48x128xf32>
    %6 = vector.broadcast %1 : vector<48x1xf32> to vector<48x128xf32>
    %7 = arith.addf %5, %6 : vector<48x128xf32>
    %8 = vector.extract_strided_slice %7 {offsets = [0, 0], sizes = [16, 128], strides = [1, 1]} : vector<48x128xf32> to vector<16x128xf32>
    %9 = vector.extract_strided_slice %7 {offsets = [16, 0], sizes = [16, 128], strides = [1, 1]} : vector<48x128xf32> to vector<16x128xf32>
    %10 = vector.extract_strided_slice %7 {offsets = [32, 0], sizes = [16, 128], strides = [1, 1]} : vector<48x128xf32> to vector<16x128xf32>
    %cst_9 = arith.constant dense<0.000000e+00> : vector<16x16xf32>
    %11 = tpu.matmul %8, %10, %cst_9 {dimension_numbers = #tpu.dot_dimension_numbers<[1], [1], [0], [0], [0, 0, 1, 0], [], []>} : vector<16x128xf32>, vector<16x128xf32>, vector<16x16xf32> -> vector<16x16xf32>
    %cst_10 = arith.constant 7.812500e-03 : f32
    %12 = vector.broadcast %cst_10 : f32 to vector<16x16xf32>
    %13 = arith.mulf %11, %12 : vector<16x16xf32>
    %cst_11 = arith.constant dense<0.000000e+00> : vector<16x128xf32>
    %14 = tpu.matmul %13, %9, %cst_11 {dimension_numbers = #tpu.dot_dimension_numbers<[1], [0], [0], [1], [0, 0, 1, 1], [], []>} : vector<16x16xf32>, vector<16x128xf32>, vector<16x128xf32> -> vector<16x128xf32>
    %cst_12 = arith.constant dense<0.000000e+00> : vector<32x128xf32>
    %15 = tpu.matmul %2, %14, %cst_12 {dimension_numbers = #tpu.dot_dimension_numbers<[1], [0], [0], [1], [0, 0, 1, 1], [], []>} : vector<32x16xf32>, vector<16x128xf32>, vector<32x128xf32> -> vector<32x128xf32>
    %16 = vector.broadcast %3 : vector<32x1xf32> to vector<32x128xf32>
    %17 = arith.addf %15, %16 : vector<32x128xf32>
    %c0_13 = arith.constant 0 : index
    %c0_14 = arith.constant 0 : index
    %18 = vector.load %arg1[%c0_13, %c0_14] : memref<32x128xf32, #tpu.memory_space<vmem>>, vector<32x128xf32>
    %19 = arith.addf %17, %18 : vector<32x128xf32>
    %c0_15 = arith.constant 0 : index
    %c0_16 = arith.constant 0 : index
    %20 = vector.load %arg6[%c0_15, %c0_16] : memref<32x128xf32, #tpu.memory_space<vmem>>, vector<32x128xf32>
    tpu.vector_store %arg6[%c0_15, %c0_16], %19 {strides = array<i32>} : memref<32x128xf32, #tpu.memory_space<vmem>>, vector<32x128xf32>,
    return
  }
  func.func @transform_0(%arg0: i32) -> (i32, i32) {
    %c0_i32 = arith.constant 0 : i32
    %c0_i32_0 = arith.constant 0 : i32
    return %c0_i32, %arg0 : i32, i32
  }
  func.func @transform_1(%arg0: i32) -> (i32, i32) {
    %c0_i32 = arith.constant 0 : i32
    %c0_i32_0 = arith.constant 0 : i32
    %c0_i32_1 = arith.constant 0 : i32
    return %c0_i32, %c0_i32_0 : i32, i32
  }
  func.func @transform_2(%arg0: i32) -> (i32, i32) {
    %c0_i32 = arith.constant 0 : i32
    %c0_i32_0 = arith.constant 0 : i32
    %c0_i32_1 = arith.constant 0 : i32
    return %c0_i32, %c0_i32_0 : i32, i32
  }
  func.func @transform_3(%arg0: i32) -> (i32, i32) {
    %c0_i32 = arith.constant 0 : i32
    %c0_i32_0 = arith.constant 0 : i32
    %c0_i32_1 = arith.constant 0 : i32
    return %c0_i32, %c0_i32_0 : i32, i32
  }
  func.func @transform_4(%arg0: i32) -> (i32, i32) {
    %c0_i32 = arith.constant 0 : i32
    %c0_i32_0 = arith.constant 0 : i32
    %c0_i32_1 = arith.constant 0 : i32
    return %c0_i32, %c0_i32_0 : i32, i32
  }
  func.func @transform_5(%arg0: i32) -> (i32, i32) {
    %c0_i32 = arith.constant 0 : i32
    %c0_i32_0 = arith.constant 0 : i32
    return %c0_i32, %arg0 : i32, i32
  }
}

</mosaic_0001>

<bundles_post_ra>
// kernel: tpu_custom_call.1
= control target key start
LH: loop header
LB: loop body
LE: loop exit
PB: predicated region body
PF: predicated region fallthrough
CT: control target
= control target key end

     0   :  { %10 = vsyncpa [#allocation4], 0  ;;  %s1259_s0 = inlined_call_operand.vmem [shape: f32[32,256], index: 0, kind: input, shape index: {}]   ;;  %s1260_s1 = inlined_call_operand.vmem [shape: f32[48,32], index: 1, kind: input, shape index: {}]   ;;  %s1261_s2 = inlined_call_operand.vmem [shape: f32[48,1], index: 2, kind: input, shape index: {}]   ;;  %s1262_s3 = inlined_call_operand.vmem [shape: f32[32,16], index: 3, kind: input, shape index: {}]   ;;  %s1263_s4 = inlined_call_operand.vmem [shape: f32[32,1], index: 4, kind: input, shape index: {}]   ;;  %s1264_s5 = inlined_call_operand.hbm [shape: f32[32,256], index: 5, kind: output, shape index: {}]  }
   0x1   :  { %12 = vsyncpa [#allocation4 + $0x1], 0  ;;  %s1055_s18 = smov 0   ;;  %s1057_s19 = smov 0  }
   0x2   :  { %s1059_s20 = smov 0   ;;  %s1061_s21 = smov 0  }
   0x3 LB: > { %s801_s22 = sadd.s32 4294967295, %s1018_s21   ;;  %s802_s23 = sadd.s32 4294967294, %s1018_s21   ;;  %s1018_s21 = sphi %s1061_s21, %s1270_s21   ;;  %s1014_s20 = sphi %s1059_s20, %s1269_s20   ;;  %s1010_s19 = sphi %s1057_s19, %s1268_s19   ;;  %s1006_s18 = sphi %s1055_s18, %s1267_s18  }
   0x4   : > { %s1078_s24 = sadd.s32 1, %s1018_s21   ;;  %s25_s25 = sadd.s32 1, %s1014_s20 }
   0x5   : > { %s22_s26 = ssub.s32 %s1018_s21, %s1078_s24  ;;  %p32_p0 = scmp.ne.s32.totalorder %s1014_s20, %s1010_s19 }
   0x6   : > { %p23_p1 = scmp.eq.s32.totalorder %s22_s26, 0  ;;  %p33_p2 = scmp.eq.s32.totalorder %s1018_s21, 0 }
   0x7   : > { %p146_p3 = scmp.eq.s32.totalorder %s801_s22, 1  ;;  %p151_p4 = scmp.ne.s32.totalorder %s1010_s19, %s1006_s18 }
   0x8   : > { %s1091_s27 = scalar_select %p23_p1, %s1014_s20, %s25_s25  }
   0x9   : > { %p34_p5 = por %p33_p2, %p32_p0  ;;  %p1093_p6 = por %p146_p3, %p32_p0 }
   0xa   : > { %p152_p7 = scmp.eq.s32.totalorder %s802_s23, 1  ;;  %p804_p9 = scmp.ge.s32.totalorder %s1018_s21, 2 }
   0xc   : > { %p1097_p8 = por %p152_p7, %p151_p4  ;;  %180 = sbr.rel (%p804_p9) target bundleno = 26 (0x1a), region = 32 }
  0x13   : > { %183 = sbr.rel (!%p34_p5) target bundleno = 26 (0x1a), region = 36  ;;  %s185_s30 = sand.u32 (%p34_p5), 1, %s1014_s20  }
  0x14   : > { %s806_s6 = sshll.u32 (%p34_p5), %s1018_s21, 3  ;;  %s805_s7 = sshll.u32 (%p34_p5), %s185_s30, 5 }
  0x15   : > { %s189_s10 = scalar_lea.vmem (%p34_p5), %s1259_s0, %s806_s6  ;;  %s187_s11 = scalar_lea.vmem (%p34_p5), [#allocation2], %s805_s7 }
  0x16   : > { %v223_v0 = vld [vmem:[%s189_s10] sm:$0xff] (%p34_p5)  ;;  %v225_v1 = vld [vmem:[%s189_s10 + $0x10] sm:$0xff] (%p34_p5) }
  0x17   : > { %v227_v2 = vld [vmem:[%s189_s10 + $0x20] sm:$0xff] (%p34_p5)  ;;  %224 = vst [vmem:[%s187_s11] sm:$0xff] (%p34_p5), %v223_v0  ;;  %226 = vst [vmem:[%s187_s11 + $0x8] sm:$0xff] (%p34_p5), %v225_v1  ;;  %v229_v3 = vld [vmem:[%s189_s10 + $0x30] sm:$0xff] (%p34_p5) }
  0x18   : > { %228 = vst [vmem:[%s187_s11 + $0x10] sm:$0xff] (%p34_p5), %v227_v2  ;;  %230 = vst [vmem:[%s187_s11 + $0x18] sm:$0xff] (%p34_p5), %v229_v3 }
  0x1a PF: > { %p807_p10 = scmp.ge.s32.totalorder %s1018_s21, 1  ;;  %p235_p11 = scmp.lt.s32.totalorder %s1018_s21, 3 }
  0x1c   : > { %p236_p12 = pnand %p807_p10, %p235_p11 }
  0x1d   : > { %s242_s12 = sand.u32 (!%p236_p12), 1, %s1010_s19   ;;  %v269_v4 = vld [vmem:[%s1260_s1] sm:$0xff] (!%p236_p12)  ;;  %vm323_vm0 = vcmask (!%p236_p12), 261120   ;;  %v1020_v5 = vmov (!%p236_p12), 0   ;;  %v280_v13 = vld [vmem:[%s1261_s2 + $0x28] sm:$0xff] (!%p236_p12)  ;;  %v277_v16 = vld [vmem:[%s1261_s2 + $0x10] sm:$0xff] (!%p236_p12) }
  0x1e   : > { %239 = sbr.rel (%p236_p12) target bundleno = 948 (0x3b4), region = 74  ;;  %s1117_s15 = sshll.u32 (!%p236_p12), %s242_s12, 5  ;;  %858 = vmatprep.mubr.msk.f32.mxu0 (!%p236_p12), %vm323_vm0, %v269_v4  ;;  %954 = vset.pattern.permute.xlu0 (!%p236_p12), %v1020_v5  ;;  %v279_v6 = vld [vmem:[%s1261_s2 + $0x20] sm:$0xff] (!%p236_p12)  ;;  %v276_v15 = vld [vmem:[%s1261_s2 + $0x8] sm:$0xff] (!%p236_p12)  ;;  %v278_v17 = vld [vmem:[%s1261_s2 + $0x18] sm:$0xff] (!%p236_p12)  ;;  %vm514_vm1 = vcmask (!%p236_p12), 130048  }
  0x1f   : > { %955 = vset.pattern.permute.xlu1 (!%p236_p12), %v1020_v5  ;;  %v275_v7 = vld [vmem:[%s1261_s2] sm:$0xff] (!%p236_p12)  ;;  %s244_s26 = scalar_lea.vmem (!%p236_p12), [#allocation2], %s1117_s15  ;;  %315 = vperm.xlu0 (!%p236_p12), %954, %v279_v6   ;;  %v270_v18 = vld [vmem:[%s1260_s1 + $0x8] sm:$0xff] (!%p236_p12)  ;;  %v271_v19 = vld [vmem:[%s1260_s1 + $0x10] sm:$0xff] (!%p236_p12)  ;;  %s268_s11 = scalar_lea.vmem (!%p236_p12), [#allocation3], %s1117_s15 }
  0x20   : > { %v1127_v8 = vld [vmem:[%s244_s26] sm:$0xff] (!%p236_p12)  ;;  %v1129_v9 = vld [vmem:[%s244_s26 + $0x8] sm:$0xff] (!%p236_p12)  ;;  %v1131_v10 = vld [vmem:[%s244_s26 + $0x10] sm:$0xff] (!%p236_p12)  ;;  %295 = vperm.xlu1 (!%p236_p12), %955, %v275_v7   ;;  %s734_s13 = sshll.u32 (!%p236_p12), %s268_s11, 4  ;;  %s823_s14 = sshll.u32 (!%p236_p12), %s801_s22, 7  ;;  %s1206_s13 = int_to_ptr.vmem [resolvable:$true] %s734_s13 }
  0x21   : > { %v891_v11 = vpack.c.bf16 (!%p236_p12), %v1129_v9, %v1127_v8  ;;  %v1135_v12 = vld [vmem:[%s244_s26 + $0x18] sm:$0xff] (!%p236_p12)  ;;  %v285_v20 = vld [vmem:[%s1263_s4] sm:$0xff] (!%p236_p12)  ;;  %v286_v21 = vld [vmem:[%s1263_s4 + $0x8] sm:$0xff] (!%p236_p12)  ;;  %s1212_s17 = scalar_lea.hbm (!%p236_p12), %s1264_s5, %s823_s14  ;;  %s1217_s22 = scalar_lea.sflag (!%p236_p12), [#allocation4], %s242_s12 }
  0x22   : > { %v895_v14 = vpack.c.bf16 (!%p236_p12), %v1135_v12, %v1131_v10  ;;  %v272_v22 = vld [vmem:[%s1260_s1 + $0x18] sm:$0xff] (!%p236_p12)  ;;  %v273_v23 = vld [vmem:[%s1260_s1 + $0x20] sm:$0xff] (!%p236_p12)  ;;  %v287_v24 = vld [vmem:[%s1263_s4 + $0x10] sm:$0xff] (!%p236_p12)  ;;  %s956_s23 = scalar_lea.vmem (!%p236_p12), %s1206_s13, 512  ;;  %s1021_s25 = smov (!%p236_p12), [#allocation3]  }
  0x23   : > { %892 = vmatprep.subr.bf16.mxu0 (!%p236_p12), %v891_v11  ;;  %320 = vperm.xlu0 (!%p236_p12), %954, %v280_v13   ;;  %v288_v25 = vld [vmem:[%s1263_s4 + $0x18] sm:$0xff] (!%p236_p12)  ;;  %v274_v26 = vld [vmem:[%s1260_s1 + $0x28] sm:$0xff] (!%p236_p12)  ;;  %v281_v51 = vld [vmem:[%s1262_s3] sm:$0xff] (!%p236_p12)  ;;  %p957_p13 = scmp.ne.s32.totalorder (!%p236_p12), %s1206_s13, %s956_s23  ;;  %s960_s26 = sshll.u32 (!%p236_p12), %s1021_s25, 4  ;;  %s961_s26 = int_to_ptr.vmem [resolvable:$false] %s960_s26 }
  0x24   : > { %894 = vmatpush3.bf16.msra.mxu0 (!%p236_p12), %v891_v11  ;;  %300 = vperm.xlu1 (!%p236_p12), %955, %v276_v15   ;;  %v282_v55 = vld [vmem:[%s1262_s3 + $0x8] sm:$0xff] (!%p236_p12)  ;;  %v283_v56 = vld [vmem:[%s1262_s3 + $0x10] sm:$0xff] (!%p236_p12)  ;;  %v284_v57 = vld [vmem:[%s1262_s3 + $0x18] sm:$0xff] (!%p236_p12)  ;;  %s962_s30 = scalar_lea.vmem (!%p236_p12), %s961_s26, 1024  ;;  %p963_p2 = scmp.lt.s32.totalorder (!%p236_p12), %s1206_s13, %s961_s26 }
  0x25   : > { %896 = vmatprep.subr.bf16.mxu0 %v895_v14  ;;  %p958_p0 = pnand %p957_p13, %p1093_p6  ;;  %p964_p3 = scmp.lt.s32.totalorder %s962_s30, %s956_s23 }
  0x27   : > { %305 = vperm.xlu0 %954, %v277_v16   ;;  %p959_p1 = pneg %p958_p0  ;;  %p965_p4 = por %p964_p3, %p963_p2 }
  0x28   : > { %898 = vmatpush3.bf16.msra.mxu0 %v895_v14  ;;  %310 = vperm.xlu1 %955, %v278_v17  }
  0x29   : > { %p966_p5 = pnand %p965_p4, %p959_p1 }
  0x2b   : > { %859 = vmatmul.mubr.msk.f32.vlgmr.msra.gmra.mrb[0].mxu0 %vm323_vm0, %v270_v18  ;;  %598 = vperm.xlu0 %954, %v285_v20  }
  0x2c   : > { %861 = vmatprep.mubr.msk.f32.mxu0 %vm323_vm0, %v271_v19  ;;  %603 = vperm.xlu1 %955, %v286_v21  }
  0x2f   : > { %862 = vmatmul.mubr.msk.f32.gmra.mrb[2].mxu0 %vm323_vm0, %v272_v22  ;;  %608 = vperm.xlu0 %954, %v287_v24  }
  0x30   : > { %864 = vmatprep.mubr.msk.f32.mxu0 %vm323_vm0, %v273_v23  ;;  %613 = vperm.xlu1 %955, %v288_v25  }
  0x33   : > { %865 = vmatmul.mubr.msk.f32.gmra.mrb[4].mxu0 %vm323_vm0, %v274_v26 }
  0x9e   : > { %v316_v28 = vpop.permute.xlu0 %315 }
  0x9f   : > { %v296_v27 = vpop.permute.xlu1 %295 }
  0xa2   : > { %v321_v30 = vpop.permute.xlu0 %320 }
  0xa3   : > { %v301_v29 = vpop.permute.xlu1 %300 }
  0xa6   : > { %v306_v36 = vpop.permute.xlu0 %305 }
  0xa7   : > { %v311_v33 = vpop.permute.xlu1 %310 }
  0xaa   : > { %v599_v59 = vpop.permute.xlu0 %598 }
  0xab   : > { %v604_v58 = vpop.permute.xlu1 %603 }
  0xae   : > { %v609_v4 = vpop.permute.xlu0 %608 }
  0xaf   : > { %v614_v1 = vpop.permute.xlu1 %613 }
  0xfe   : > { %v860_v31 = vpop.f32.mrb[0].mxu0 }
  0xff   : > { %v408_v32 = vpop.f32.mrb[1].mxu0  ;;  %v414_v46 = vadd.f32 %v860_v31, %v301_v29 }
 0x100   : > { %v409_v34 = vadd.f32 %v408_v32, %v296_v27 }
 0x102   : > { %v863_v35 = vpop.f32.mrb[2].mxu0  ;;  %871 = vmatprep.mubr.f32.mxu1 %v409_v34 }
 0x103   : > { %v424_v37 = vadd.f32 %v863_v35, %v311_v33  ;;  %v418_v38 = vpop.f32.mrb[3].mxu0 }
 0x104   : > { %v419_v39 = vadd.f32 %v418_v38, %v306_v36 }
 0x106   : > { %v903_v40 = vpack.c.bf16 %v424_v37, %v419_v39  ;;  %v866_v41 = vpop.f32.mrb[4].mxu0 }
 0x107   : > { %v434_v42 = vadd.f32 %v866_v41, %v321_v30  ;;  %v428_v43 = vpop.f32.mrb[5].mxu0 }
 0x108   : > { %v429_v44 = vadd.f32 %v428_v43, %v316_v28 }
 0x10a   : > { %v899_v45 = vpack.c.bf16 %v434_v42, %v429_v44 }
 0x10c   : > { %900 = vmatprep.subr.bf16.mxu1 %v899_v45 }
 0x10d   : > { %902 = vmatpush3.bf16.xpose.msra.mxu1 %v899_v45 }
 0x10e   : > { %904 = vmatprep.subr.bf16.mxu1 %v903_v40 }
 0x114   : > { %872 = vmatmul.mubr.f32.vlgmr.msra.gmra.mrb[0].mxu1 %v414_v46 }
 0x115   : > { %906 = vmatpush3.bf16.msra.mxu1 %v903_v40 }
 0x1e7   : > { %v873_v47 = vpop.f32.mrb[0].mxu1 }
 0x1e8   : > { %v503_v48 = vpop.f32.mrb[1].mxu1  ;;  %v513_v50 = vmul.f32 0.0078125, %v873_v47 }
 0x1e9   : > { %v512_v49 = vmul.f32 0.0078125, %v503_v48 }
 0x1eb   : > { %878 = vmatprep.mubr.msk.f32.mxu1 %vm514_vm1, %v512_v49 }
 0x1ec   : > { %879 = vmatmul.mubr.msk.f32.vlgmr.msra.gmra.mrb[2].mxu1 %vm514_vm1, %v513_v50 }
 0x1ed   : > { %885 = vmatprep.mubr.msk.f32.mxu1 %vm514_vm1, %v281_v51 }
 0x2bf   : > { %v880_v52 = vpop.f32.mrb[2].mxu1 }
 0x2c0   : > { %v587_v53 = vpop.f32.mrb[3].mxu1 }
 0x2c1   : > { %v907_v54 = vpack.c.bf16 %v880_v52, %v587_v53 }
 0x2c3   : > { %908 = vmatprep.subr.bf16.mxu1 %v907_v54 }
 0x2c4   : > { %910 = vmatpush3.bf16.msra.mxu1 %v907_v54 }
 0x2c7   : > { %886 = vmatmul.mubr.msk.f32.vlgmr.msra.gmra.mrb[4].mxu1 %vm514_vm1, %v282_v55 }
 0x2c8   : > { %888 = vmatprep.mubr.msk.f32.mxu1 %vm514_vm1, %v283_v56 }
 0x2cb   : > { %889 = vmatmul.mubr.msk.f32.gmra.mrb[6].mxu1 %vm514_vm1, %v284_v57 }
 0x39a   : > { %v887_v60 = vpop.f32.mrb[4].mxu1 }
 0x39b   : > { %v700_v61 = vadd.f32 %v887_v60, %v604_v58  ;;  %v694_v62 = vpop.f32.mrb[5].mxu1 }
 0x39c   : > { %v695_v63 = vadd.f32 %v694_v62, %v599_v59 }
 0x39d   : > { %v714_v0 = vadd.f32 %v700_v61, %v1129_v9 }
 0x39e   : > { %v713_v2 = vadd.f32 %v695_v63, %v1127_v8  ;;  %v890_v3 = vpop.f32.mrb[6].mxu1 }
 0x39f   : > { %718 = vst [vmem:[%s268_s11 + $0x8] sm:$0xff] %v714_v0  ;;  %v710_v5 = vadd.f32 %v890_v3, %v614_v1  ;;  %v704_v6 = vpop.f32.mrb[7].mxu1 }
 0x3a0   : > { %717 = vst [vmem:[%s268_s11] sm:$0xff] %v713_v2  ;;  %v705_v7 = vadd.f32 %v704_v6, %v609_v4 }
 0x3a1   : > { %v716_v9 = vadd.f32 %v710_v5, %v1135_v12 }
 0x3a2   : > { %v715_v8 = vadd.f32 %v705_v7, %v1131_v10 }
 0x3a3   : > { %720 = vst [vmem:[%s268_s11 + $0x18] sm:$0xff] %v716_v9 }
 0x3a4   : > { %719 = vst [vmem:[%s268_s11 + $0x10] sm:$0xff] %v715_v8 }
 0x3a5   : > { %969 = shalt.err (!%p966_p5)
}
 0x3a6   : > { %s970_s12 = scalar_lea.hbm %s1212_s17, 512  ;;  %s974_s8 = scalar_lea.hbm %s1264_s5, 1024 }
 0x3a7   : > { %p971_p7 = scmp.ne.s32.totalorder %s1212_s17, %s970_s12  ;;  %p975_p12 = scmp.lt.u32.totalorder %s1212_s17, %s1264_s5 }
 0x3a8   : > { %p976_p13 = scmp.lt.u32.totalorder %s974_s8, %s970_s12  ;;  %p978_p1 = scmp.lt.u32.totalorder %s970_s12, %s1212_s17 }
 0x3a9   : > { %p972_p10 = pnand %p971_p7, %p1093_p6 }
 0x3aa   : > { %p977_p0 = por %p976_p13, %p975_p12 }
 0x3ab   : > { %p973_p11 = pneg %p972_p10 }
 0x3ac   : > { %p979_p2 = por %p978_p1, %p977_p0 }
 0x3ae   : > { %p980_p3 = pnand %p979_p2, %p973_p11 }
 0x3b0   : > { %983 = shalt.err (!%p980_p3)
}
 0x3b1   : > { %s1022_s11 = smov 128   ;;  %s1023_s14 = smov 256  }
 0x3b2   : > { %s1024_s15 = smov 8  }
 0x3b3   : > { %911 = dma.vmem_to_hbm [thread:$0]  (%p1093_p6), %s1206_s13, 512, %s1212_s17, %s1217_s22, %s1022_s11, %s1023_s14, %s1024_s15  }
 0x3b4 PF: > { %s749_s16 = sand.u32 1, %s1006_s18   ;;  %p914_p4 = pnand %p804_p9, %p1097_p8 }
 0x3b5   : > { %s750_s23 = scalar_lea.sflag [#allocation4], %s749_s16 }
 0x3b6   : > { %1001 = dma.done.wait (!%p914_p4), %s750_s23, 512  }
 0x3b7   : > { %1003 = vsyncadd (!%p914_p4), %s750_s23, 4294966784  ;;  %p15_p5 = scmp.ge.s32.totalorder %s1078_s24, 4   ;;  %s1267_s18 = smov %s1010_s19 }
 0x3b8   : > { %s1268_s19 = smov %s1014_s20  ;;  %s1269_s20 = smov %s1091_s27 }
 0x3b9   : > { %s1270_s21 = smov %s1078_s24  ;;  %17 = sbr.rel (!%p15_p5) target bundleno = 3 (0x3), region = 118 }
 0x3c0   :  { %755 = vsyncpa [#allocation4], 1 }
 0x3c1   :  { %757 = vsyncpa [#allocation4 + $0x1], 1 }

</bundles_post_ra>
